<compile_context>
chip_gen: v7x
topology: tpu7x:2x2x1
jax: 0.10.0
libtpu: 0.0.40
codegen_flags: <defaults>
</compile_context>

<pallas_src>
import functools

import jax
import jax.numpy as jnp
from jax.experimental import pallas as pl
from jax.experimental.pallas import tpu as pltpu


def _cin_kernel(x_ref, p_ref, o_ref, *, eps: float, hw_true: int, needs_mask: bool):
    # x_ref: (rows_tile, HW_pad)   one row == one (n, c) instance
    # p_ref: (rows_tile, 8)        lane 0 = gamma, lane 1 = beta
    x = x_ref[...]
    xf = x.astype(jnp.float32)
    inv_hw = jnp.float32(1.0 / hw_true)

    # Stats in f32.  Pad lanes of x are zero, so the plain sum is correct for
    # the mean; the centered term needs masking when the lane dim is padded.
    mean = jnp.sum(xf, axis=-1, keepdims=True) * inv_hw          # (rows, 1)
    d = xf - mean
    if needs_mask:
        lane = jax.lax.broadcasted_iota(jnp.int32, xf.shape, 1)
        dm = jnp.where(lane < hw_true, d, 0.0)
        var = jnp.sum(dm * dm, axis=-1, keepdims=True) * inv_hw
    else:
        var = jnp.sum(d * d, axis=-1, keepdims=True) * inv_hw
    inv = jax.lax.rsqrt(var + eps)                               # (rows, 1)

    gamma = p_ref[:, 0:1].astype(jnp.float32)                    # (rows, 1)
    beta = p_ref[:, 1:2].astype(jnp.float32)                     # (rows, 1)
    scale = inv * gamma                                          # (rows, 1)
    bias = beta - mean * scale                                   # (rows, 1)

    if o_ref.dtype == jnp.float32:
        o_ref[...] = xf * scale + bias
    else:
        # bf16 (v6e/v7x): keep the full-tile elementwise tail in the input
        # dtype; only the per-row stats were computed in f32.
        o_ref[...] = (x * scale.astype(x.dtype) + bias.astype(x.dtype)).astype(o_ref.dtype)


def _round_up(a: int, b: int) -> int:
    return (a + b - 1) // b * b


def _vmem_limit_bytes() -> int:
    """Conservative VMEM limit that is safe on v5e/v6e (128 MiB) and v7x (64 MiB)."""
    limit = 48 * 1024 * 1024
    try:
        cap = getattr(pltpu.get_tpu_info(), "vmem_capacity_bytes", None)
        if cap is not None and int(cap) >= 96 * 1024 * 1024:
            limit = 64 * 1024 * 1024      # v5e / v6e: plenty of physical headroom
    except Exception:
        pass
    return limit


def _instance_norm_affine(x, gamma, beta, *, eps=1e-5):
    """Instance norm (biased variance over H*W) with per-channel affine."""
    N, C, H, W = x.shape
    NC, HW = N * C, H * W
    dtype = x.dtype
    itemsize = jnp.dtype(dtype).itemsize

    HW_pad = _round_up(HW, 128)       # lane-dense blocks / unmasked stores
    nc8 = _round_up(NC, 8)

    # --- VMEM-budget-driven row tile -------------------------------------
    vmem_limit = _vmem_limit_bytes()
    block_budget = vmem_limit - 8 * 1024 * 1024        # headroom for params/scratch
    bytes_per_row = 4 * HW_pad * itemsize               # 2x double-buffered in + out
    max_rows = max(8, (block_budget // bytes_per_row) // 8 * 8)
    rows_tile = int(min(nc8, max_rows, 2048))
    # Keep >= 2 grid steps when there is enough work (software pipelining and
    # megacore sharding of the "parallel" axis on v7x).
    if nc8 >= 16:
        rows_tile = min(rows_tile, max(8, (nc8 // 2) // 8 * 8))

    grid_rows = pl.cdiv(NC, rows_tile)
    NC_pad = grid_rows * rows_tile

    # Make sure the limit we request covers the blocks we ask for.
    # TODO(synk): for very large H*W (a single 8-row block over ~40 MiB) the
    # spatial axis should be tiled with a two-pass reduction instead.
    vmem_limit = int(max(vmem_limit, rows_tile * bytes_per_row + 4 * 1024 * 1024))

    # --- data layout: one (n, c) instance per row, spatial on lanes --------
    x2 = x.reshape(NC, HW)
    if NC_pad != NC or HW_pad != HW:
        x2 = jnp.pad(x2, ((0, NC_pad - NC), (0, HW_pad - HW)))

    # gamma/beta packed into one small per-row array: lane 0 = gamma, lane 1 = beta.
    g_rows = jnp.tile(gamma.astype(jnp.float32), (N,))           # (NC,)
    b_rows = jnp.tile(beta.astype(jnp.float32), (N,))            # (NC,)
    params = jnp.stack([g_rows, b_rows], axis=-1)                # (NC, 2)
    params = jnp.pad(params, ((0, NC_pad - NC), (0, 8 - 2)))     # (NC_pad, 8)

    kernel = functools.partial(
        _cin_kernel, eps=float(eps), hw_true=HW, needs_mask=(HW_pad != HW))

    out2 = pl.pallas_call(
        kernel,
        out_shape=jax.ShapeDtypeStruct((NC_pad, HW_pad), dtype),
        grid=(grid_rows,),
        in_specs=[
            pl.BlockSpec((rows_tile, HW_pad), lambda i: (i, 0)),
            pl.BlockSpec((rows_tile, 8), lambda i: (i, 0)),
        ],
        out_specs=pl.BlockSpec((rows_tile, HW_pad), lambda i: (i, 0)),
        compiler_params=pltpu.CompilerParams(
            dimension_semantics=("parallel",),
            vmem_limit_bytes=vmem_limit),
    )(x2, params)

    out2 = out2[:NC, :HW]
    return out2.reshape(N, C, H, W)


def cin_forward(x, gammas, betas, style_id=0, style_weights=None, mix=False):
    """CIN.forward equivalent.

    gammas / betas: (style_num, C) parameters of the per-style InstanceNorm2d.
    If mix=False  -> use style `style_id` (training / non-mix path).
    If mix=True   -> gamma/beta are weighted sums over styles (mix path).
    """
    if mix and style_weights is not None:
        w = jnp.asarray(style_weights, dtype=gammas.dtype)       # (S,)
        gamma = jnp.einsum("s,sc->c", w, gammas)
        beta = jnp.einsum("s,sc->c", w, betas)
    else:
        gamma = gammas[style_id]
        beta = betas[style_id]
    return _instance_norm_affine(x, gamma, beta, eps=1e-5)


def _reference(x, gamma, beta, eps=1e-5):
    xf = x.astype(jnp.float32)
    mean = jnp.mean(xf, axis=(2, 3), keepdims=True)
    var = jnp.mean((xf - mean) ** 2, axis=(2, 3), keepdims=True)
    y = (xf - mean) / jnp.sqrt(var + eps)
    return (y * gamma[None, :, None, None] + beta[None, :, None, None]).astype(x.dtype)


if __name__ == "__main__":
    key = jax.random.PRNGKey(0)
    kx, kg, kb = jax.random.split(key, 3)

    N, C, H, W = 2, 4, 16, 16
    style_num = 3

    x = jax.random.normal(kx, (N, C, H, W), dtype=jnp.float32)
    # Deterministic synthetic per-style affine params (PyTorch default init is
    # ones/zeros; use random values so styles are distinguishable).
    gammas = 1.0 + 0.1 * jax.random.normal(kg, (style_num, C), dtype=jnp.float32)
    betas = 0.1 * jax.random.normal(kb, (style_num, C), dtype=jnp.float32)

    # Path 1: single style (training / mix=False)
    out1 = cin_forward(x, gammas, betas, style_id=1, mix=False)
    jax.block_until_ready(out1)
    ref1 = _reference(x, gammas[1], betas[1])
    assert jnp.allclose(out1, ref1, atol=1e-4, rtol=1e-4)

    # Path 2: style mixing (eval, mix=True)
    style_weights = [0.2, 0.5, 0.3]
    out2 = cin_forward(x, gammas, betas, style_weights=style_weights, mix=True)
    jax.block_until_ready(out2)
    w = jnp.asarray(style_weights, dtype=jnp.float32)
    ref2 = _reference(x, w @ gammas, w @ betas)
    assert jnp.allclose(out2, ref2, atol=1e-4, rtol=1e-4)

    print("KERNEL_OK")
</pallas_src>

<mosaic_0001>
module attributes {stable_mosaic.version = 11 : i64} {
  func.func @_cin_kernel(%arg0: i32, %arg1: memref<8x256xf32, #tpu.memory_space<vmem>>, %arg2: memref<8x8xf32, #tpu.memory_space<vmem>>, %arg3: memref<8x256xf32, #tpu.memory_space<vmem>>) attributes {dimension_semantics = [#tpu.dimension_semantics<parallel>], iteration_bounds = array<i64: 1>, scalar_prefetch = 0 : i64, scratch_operands = 0 : i64, tpu.core_type = #tpu.core_type<tc>, window_params = [{transform_indices = @transform_0, window_bounds = array<i64: 8, 256>}, {transform_indices = @transform_1, window_bounds = array<i64: 8, 8>}, {transform_indices = @transform_2, window_bounds = array<i64: 8, 256>}]} {
    %c0 = arith.constant 0 : index
    %c0_0 = arith.constant 0 : index
    %0 = vector.load %arg1[%c0, %c0_0] : memref<8x256xf32, #tpu.memory_space<vmem>>, vector<8x256xf32>
    %cst = arith.constant dense<0.000000e+00> : vector<8xf32>
    %1 = vector.multi_reduction <add>, %0, %cst [1] : vector<8x256xf32> to vector<8xf32>
    %2 = vector.shape_cast %1 : vector<8xf32> to vector<8x1xf32>
    %cst_1 = arith.constant 3.906250e-03 : f32
    %3 = vector.broadcast %cst_1 : f32 to vector<8x1xf32>
    %4 = arith.mulf %2, %3 : vector<8x1xf32>
    %5 = vector.broadcast %4 : vector<8x1xf32> to vector<8x256xf32>
    %6 = arith.subf %0, %5 : vector<8x256xf32>
    %7 = arith.mulf %6, %6 : vector<8x256xf32>
    %cst_2 = arith.constant dense<0.000000e+00> : vector<8xf32>
    %8 = vector.multi_reduction <add>, %7, %cst_2 [1] : vector<8x256xf32> to vector<8xf32>
    %9 = vector.shape_cast %8 : vector<8xf32> to vector<8x1xf32>
    %cst_3 = arith.constant 3.906250e-03 : f32
    %10 = vector.broadcast %cst_3 : f32 to vector<8x1xf32>
    %11 = arith.mulf %9, %10 : vector<8x1xf32>
    %cst_4 = arith.constant 9.99999974E-6 : f32
    %12 = vector.broadcast %cst_4 : f32 to vector<8x1xf32>
    %13 = arith.addf %11, %12 : vector<8x1xf32>
    %14 = math.rsqrt %13 : vector<8x1xf32>
    %c0_5 = arith.constant 0 : index
    %c0_6 = arith.constant 0 : index
    %15 = vector.load %arg2[%c0_5, %c0_6] : memref<8x8xf32, #tpu.memory_space<vmem>>, vector<8x1xf32>
    %c0_7 = arith.constant 0 : index
    %c1 = arith.constant 1 : index
    %16 = vector.load %arg2[%c0_7, %c1] : memref<8x8xf32, #tpu.memory_space<vmem>>, vector<8x1xf32>
    %17 = arith.mulf %14, %15 : vector<8x1xf32>
    %18 = arith.mulf %4, %17 : vector<8x1xf32>
    %19 = arith.subf %16, %18 : vector<8x1xf32>
    %20 = vector.broadcast %17 : vector<8x1xf32> to vector<8x256xf32>
    %21 = arith.mulf %0, %20 : vector<8x256xf32>
    %22 = vector.broadcast %19 : vector<8x1xf32> to vector<8x256xf32>
    %23 = arith.addf %21, %22 : vector<8x256xf32>
    %c0_8 = arith.constant 0 : index
    %c0_9 = arith.constant 0 : index
    %24 = vector.load %arg3[%c0_8, %c0_9] : memref<8x256xf32, #tpu.memory_space<vmem>>, vector<8x256xf32>
    tpu.vector_store %arg3[%c0_8, %c0_9], %23 {strides = array<i32>} : memref<8x256xf32, #tpu.memory_space<vmem>>, vector<8x256xf32>,
    return
  }
  func.func @transform_0(%arg0: i32) -> (i32, i32) {
    %c0_i32 = arith.constant 0 : i32
    %c0_i32_0 = arith.constant 0 : i32
    return %arg0, %c0_i32 : i32, i32
  }
  func.func @transform_1(%arg0: i32) -> (i32, i32) {
    %c0_i32 = arith.constant 0 : i32
    %c0_i32_0 = arith.constant 0 : i32
    return %arg0, %c0_i32 : i32, i32
  }
  func.func @transform_2(%arg0: i32) -> (i32, i32) {
    %c0_i32 = arith.constant 0 : i32
    %c0_i32_0 = arith.constant 0 : i32
    return %arg0, %c0_i32 : i32, i32
  }
}

</mosaic_0001>

<bundles_post_ra>
// kernel: tpu_custom_call.1
= control target key start
LH: loop header
LB: loop body
LE: loop exit
PB: predicated region body
PF: predicated region fallthrough
CT: control target
= control target key end

     0   :  { %7 = vsyncpa [#allocation3], 0  ;;  %s231_s0 = inlined_call_operand.hbm [shape: f32[8,256], index: 0, kind: input, shape index: {}]   ;;  %s232_s1 = inlined_call_operand.hbm [shape: f32[8,8], index: 1, kind: input, shape index: {}]   ;;  %s233_s2 = inlined_call_operand.hbm [shape: f32[8,256], index: 2, kind: output, shape index: {}]  }
   0x1   :  { %8 = vsyncpa [#allocation6], 0 }
   0x2   :  { %9 = vsyncpa [#allocation4], 0  ;;  %s174_s9 = smov [#allocation2]   ;;  %s175_s11 = smov [#allocation5]  }
   0x3   :  { %s16_s10 = sshll.u32 %s174_s9, 4  ;;  %s26_s12 = sshll.u32 %s175_s11, 4  ;;  %s17_s10 = int_to_ptr.vmem [resolvable:$true] %s16_s10  ;;  %s27_s12 = int_to_ptr.vmem [resolvable:$true] %s26_s12 }
   0x4   :  { %s102_s15 = scalar_lea.hbm %s231_s0, 256 }
   0x5   :  { %p103_p0 = scmp.ne.s32.totalorder %s231_s0, %s102_s15  ;;  %p106_p1 = scmp.lt.u32.totalorder %s102_s15, %s231_s0 }
   0x7   :  { %p108_p2 = pnand %p106_p1, %p103_p0 }
   0x9   :  { %111 = shalt.err (!%p108_p2)
}
   0xa   :  { %s112_s20 = scalar_lea.vmem %s17_s10, 256  ;;  %p117_p4 = scmp.lt.s32.totalorder %s17_s10, %s17_s10 }
   0xb   :  { %p113_p3 = scmp.ne.s32.totalorder %s17_s10, %s112_s20  ;;  %p118_p5 = scmp.lt.s32.totalorder %s112_s20, %s112_s20 }
   0xd   :  { %p119_p6 = por %p118_p5, %p117_p4 }
   0xf   :  { %p120_p7 = pnand %p119_p6, %p113_p3 }
  0x11   :  { %123 = shalt.err (!%p120_p7)
}
  0x12   :  { %19 = dma.hbm_to_vmem [thread:$0]  %s231_s0, 256, %s17_s10, [#allocation3]  }
  0x13   :  { %s124_s25 = scalar_lea.hbm %s232_s1, 128 }
  0x14   :  { %p125_p8 = scmp.ne.s32.totalorder %s232_s1, %s124_s25  ;;  %p128_p9 = scmp.lt.u32.totalorder %s124_s25, %s232_s1 }
  0x16   :  { %p130_p10 = pnand %p128_p9, %p125_p8 }
  0x18   :  { %133 = shalt.err (!%p130_p10)
}
  0x19   :  { %s134_s30 = scalar_lea.vmem %s27_s12, 128  ;;  %p139_p12 = scmp.lt.s32.totalorder %s27_s12, %s27_s12 }
  0x1a   :  { %p135_p11 = scmp.ne.s32.totalorder %s27_s12, %s134_s30  ;;  %p140_p13 = scmp.lt.s32.totalorder %s134_s30, %s134_s30 }
  0x1c   :  { %p141_p0 = por %p140_p13, %p139_p12 }
  0x1e   :  { %p142_p1 = pnand %p141_p0, %p135_p11 }
  0x20   :  { %145 = shalt.err (!%p142_p1)
}
  0x21   :  { %29 = dma.hbm_to_vmem [thread:$0]  %s232_s1, 128, %s27_s12, [#allocation6]  }
  0x22   :  { %168 = dma.done.wait [#allocation3], 256  }
  0x23   :  { %169 = vsyncadd [#allocation3], 4294967040 }
  0x24   :  { %170 = dma.done.wait [#allocation6], 128  }
  0x25   :  { %171 = vsyncadd [#allocation6], 4294967168  ;;  %v36_v0 = vld [vmem:[#allocation2] sm:$0xff]  ;;  %v37_v1 = vld [vmem:[#allocation2 + $0x8] sm:$0xff]  ;;  %v176_v10 = vmov 0   ;;  %v177_v14 = vmov 1  }
  0x26   :  { %v38_v2 = vadd.f32 %v37_v1, %v36_v0  ;;  %98 = vset.pattern.permute.xlu1 %v176_v10  ;;  %99 = vset.pattern.permute.xlu0 %v177_v14  ;;  %v52_v15 = vld [vmem:[#allocation5] sm:$0xff]  ;;  %s178_s1 = smov 1   ;;  %s179_s4 = smov [#allocation7]  }
  0x27   :  { %s82_s5 = sshll.u32 %s179_s4, 4  ;;  %s83_s5 = int_to_ptr.vmem [resolvable:$true] %s82_s5 }
  0x28   :  { %39 = vadd.xlane.f32.xlu0 %v38_v2  ;;  %s146_s6 = scalar_lea.vmem %s83_s5, 256  ;;  %p151_p3 = scmp.lt.s32.totalorder %s83_s5, %s83_s5 }
  0x29   :  { %p147_p2 = scmp.ne.s32.totalorder %s83_s5, %s146_s6  ;;  %p152_p4 = scmp.lt.s32.totalorder %s146_s6, %s146_s6 }
  0x2b   :  { %p153_p5 = por %p152_p4, %p151_p3 }
  0x2d   :  { %p154_p6 = pnand %p153_p5, %p147_p2 }
  0xb5   :  { %v40_v3 = vpop.xlane.xlu0 %39 }
  0xb6   :  { %v41_v4 = vmul.f32 0.00390625, %v40_v3 }
  0xb8   :  { %v42_v5 = vsub.f32 %v36_v0, %v41_v4  ;;  %v43_v6 = vsub.f32 %v37_v1, %v41_v4 }
  0xba   :  { %v44_v7 = vmul.f32 %v42_v5, %v42_v5  ;;  %v45_v8 = vmul.f32 %v43_v6, %v43_v6 }
  0xbc   :  { %v46_v9 = vadd.f32 %v45_v8, %v44_v7 }
  0xbe   :  { %47 = vadd.xlane.f32.xlu0 %v46_v9 }
 0x14b   :  { %v48_v11 = vpop.xlane.xlu0 %47 }
 0x14c   :  { %v49_v12 = vmul.f32 0.00390625, %v48_v11 }
 0x14e   :  { %v50_v13 = vadd.f32 1e-05, %v49_v12 }
 0x150   :  { %100 = vrsqrt.f32 %v50_v13 }
 0x15a   :  { %v101_v16 = vpop.eup %100 }
 0x15b   :  { %v53_v17 = vmul.f32 %v101_v16, %v52_v15 }
 0x15d   :  { %v54_v18 = vmul.f32 %v53_v17, %v41_v4 }
 0x15f   :  { %56 = vrot.lane.b32.xlu1 %v54_v18, %s178_s1 }
 0x163   :  { %62 = vperm.xlu1 %98, %v53_v17  }
 0x1d1   :  { %v57_v19 = vpop.permute.xlu1 %56 }
 0x1d2   :  { %v59_v20 = vsub.f32 %v52_v15, %v57_v19 }
 0x1d4   :  { %69 = vperm.xlu0 %99, %v59_v20  }
 0x1e2   :  { %v63_v21 = vpop.permute.xlu1 %62 }
 0x1e3   :  { %v65_v22 = vmul.f32 %v63_v21, %v36_v0  ;;  %v66_v23 = vmul.f32 %v63_v21, %v37_v1 }
 0x253   :  { %v70_v24 = vpop.permute.xlu0 %69 }
 0x254   :  { %v72_v25 = vadd.f32 %v70_v24, %v65_v22  ;;  %v73_v26 = vadd.f32 %v70_v24, %v66_v23 }
 0x256   :  { %74 = vst [vmem:[#allocation7] sm:$0xff] %v72_v25  ;;  %75 = vst [vmem:[#allocation7 + $0x8] sm:$0xff] %v73_v26 }
 0x257   :  { %157 = shalt.err (!%p154_p6)
}
 0x258   :  { %s158_s9 = scalar_lea.hbm %s233_s2, 256 }
 0x259   :  { %p159_p7 = scmp.ne.s32.totalorder %s233_s2, %s158_s9  ;;  %p162_p8 = scmp.lt.u32.totalorder %s158_s9, %s233_s2 }
 0x25b   :  { %p164_p9 = pnand %p162_p8, %p159_p7 }
 0x25d   :  { %167 = shalt.err (!%p164_p9)
}
 0x25e   :  { %85 = dma.vmem_to_hbm [thread:$0]  %s83_s5, 256, %s233_s2, [#allocation4]  }
 0x25f   :  { %172 = dma.done.wait [#allocation4], 256  }
 0x260   :  { %173 = vsyncadd [#allocation4], 4294967040 }
 0x261   :  { %89 = vsyncpa [#allocation3], 1 }
 0x262   :  { %90 = vsyncpa [#allocation6], 1 }
 0x263   :  { %91 = vsyncpa [#allocation4], 1 }

</bundles_post_ra>
